<compile_context>
chip_gen: v5e
topology: v5e:2x2
jax: 0.10.0
libtpu: 0.0.40
codegen_flags: <defaults>
</compile_context>

<pallas_src>
import functools

import jax
import jax.numpy as jnp
from jax import lax
from jax.experimental import pallas as pl
from jax.experimental.pallas import tpu as pltpu


def _bn_kernel(x_ref, gamma_ref, beta_ref, o_ref,
               sum8_ref, sq8_ref, scale_ref, shift_ref,
               *, eps, m_inv, groups):
    p = pl.program_id(0)            # 0 = stats pass, 1 = normalize pass
    i = pl.program_id(1)            # M-tile index
    nt = pl.num_programs(1)
    w = x_ref.shape[-1]             # packed lane width (128 when packed)
    lane_c = w // groups            # = C (channels per packed group)

    @pl.when(p == 0)
    def _stats():
        @pl.when(i == 0)
        def _init():
            sum8_ref[...] = jnp.zeros_like(sum8_ref)
            sq8_ref[...] = jnp.zeros_like(sq8_ref)

        # TODO(synk): keep this math in bf16 on v6e/v7x for bf16 inputs
        # (v5e has no bf16 VPU, so we upcast for portability).
        x = x_ref[...].astype(jnp.float32)              # (TM, W)
        x3 = x.reshape(x.shape[0] // 8, 8, w)
        # Sublane-shaped partial sums: pure VPU adds per tile; the single
        # cross-sublane (XLU) reduction happens once, after the last tile.
        sum8_ref[...] += jnp.sum(x3, axis=0)
        sq8_ref[...] += jnp.sum(x3 * x3, axis=0)

        @pl.when(i == nt - 1)
        def _finalize():
            s8 = sum8_ref[...]
            q8 = sq8_ref[...]
            # Lane-fold the packed channel groups (log2(groups) roll+adds):
            # afterwards every C-lane group holds the full per-channel sums,
            # which is exactly the replication the packed normalize needs.
            sh, g = lane_c, groups
            while g > 1:
                s8 = s8 + pltpu.roll(s8, shift=sh, axis=1)
                q8 = q8 + pltpu.roll(q8, shift=sh, axis=1)
                sh *= 2
                g //= 2
            s = jnp.sum(s8, axis=0, keepdims=True)      # (1, W)
            q = jnp.sum(q8, axis=0, keepdims=True)      # (1, W)
            mean = s * m_inv
            var = q * m_inv - mean * mean               # biased batch variance
            inv_std = lax.rsqrt(var + eps)
            scale = gamma_ref[...] * inv_std            # fused affine
            scale_ref[...] = scale
            shift_ref[...] = beta_ref[...] - mean * scale

    @pl.when(p == 1)
    def _normalize():
        x = x_ref[...].astype(jnp.float32)
        # 2 VALU ops / element: y = x * scale + shift.
        o_ref[...] = (x * scale_ref[...] + shift_ref[...]).astype(o_ref.dtype)


def my_batch_norm(x, gamma, beta, eps=1e-5, block_rows=512):
    """Forward of MyBatchNorm: supports 2-D (B, C) and 3-D (B, L, C) inputs."""
    if x.ndim == 3:
        b, l, c = x.shape
        x2 = x.reshape(b * l, c)
    elif x.ndim == 2:
        x2 = x
        c = x.shape[-1]
    else:
        raise ValueError("MyBatchNorm only supports 2-D or 3-D inputs")
    orig_shape = x.shape
    m_true = x2.shape[0]

    # Lane packing: fold `groups` consecutive samples into one 128-wide lane
    # row (free, contiguous reshape) so vregs are lane-dense.
    if c < 128 and 128 % c == 0:
        groups = 128 // c
    else:
        groups = 1                      # fallback: c >= 128 or awkward C
    w = groups * c

    assert block_rows % 8 == 0
    m_packed = -(-m_true // groups)                      # packed rows needed
    if m_packed > block_rows:
        tm = block_rows                                  # ~512*128*4B = 256 KiB/tile
    else:
        tm = max(8, -(-m_packed // 8) * 8)               # single tile, 8-aligned
    m_packed_pad = -(-m_packed // tm) * tm
    num_tiles = m_packed_pad // tm
    m_rows_pad = m_packed_pad * groups

    pad = m_rows_pad - m_true
    if pad:
        # Zero rows add nothing to sum / sum-of-squares and we divide by the
        # true M, so stats stay exact; padded outputs are sliced away below.
        x2 = jnp.pad(x2, ((0, pad), (0, 0)))
    xp = x2.reshape(m_packed_pad, w)

    gamma_p = jnp.tile(gamma.astype(jnp.float32).reshape(1, c), (1, groups))
    beta_p = jnp.tile(beta.astype(jnp.float32).reshape(1, c), (1, groups))

    kernel = functools.partial(
        _bn_kernel, eps=eps, m_inv=1.0 / m_true, groups=groups)

    out = pl.pallas_call(
        kernel,
        out_shape=jax.ShapeDtypeStruct((m_packed_pad, w), x2.dtype),
        grid=(2, num_tiles),
        in_specs=[
            pl.BlockSpec((tm, w), lambda p, i: (i, 0)),
            pl.BlockSpec((1, w), lambda p, i: (0, 0)),   # resident across grid
            pl.BlockSpec((1, w), lambda p, i: (0, 0)),
        ],
        # Phase 0 never writes the output; pinning its block index at 0 keeps
        # the (untouched) output buffer resident during the stats phase, so
        # only phase 1 streams each output tile out exactly once.
        out_specs=pl.BlockSpec((tm, w), lambda p, i: (p * i, 0)),
        scratch_shapes=[
            pltpu.VMEM((8, w), jnp.float32),   # per-sublane partial sums
            pltpu.VMEM((8, w), jnp.float32),   # per-sublane partial sum-of-squares
            pltpu.VMEM((1, w), jnp.float32),   # fused scale = gamma * inv_std
            pltpu.VMEM((1, w), jnp.float32),   # fused shift = beta - mean*scale
        ],
        compiler_params=pltpu.CompilerParams(
            # Phase axis must be sequential (stats before normalize); the tile
            # axis is a cross-tile reduction in phase 0, so sequential too.
            # TODO(synk): v7x megacore — run the normalize tiles on both
            # TensorCores (needs per-core partial stats + a combine step).
            dimension_semantics=("arbitrary", "arbitrary")),
    )(xp, gamma_p, beta_p)

    out = out.reshape(m_rows_pad, c)[:m_true]
    return out.reshape(orig_shape)


def _reference_bn(x, gamma, beta, eps=1e-5):
    # Pure-JAX reference of training-mode BatchNorm1d (biased variance).
    axes = (0, 1) if x.ndim == 3 else (0,)
    mean = jnp.mean(x, axis=axes, keepdims=True)
    var = jnp.mean((x - mean) ** 2, axis=axes, keepdims=True)
    return (x - mean) / jnp.sqrt(var + eps) * gamma + beta


if __name__ == "__main__":
    key = jax.random.PRNGKey(0)
    n = 32  # number of channels (BatchNorm1d(n))

    # Deterministic parameter init matching nn.BatchNorm1d defaults.
    gamma = jnp.ones((n,), dtype=jnp.float32)
    beta = jnp.zeros((n,), dtype=jnp.float32)

    k2d, k3d, kbig = jax.random.split(key, 3)

    # 2-D branch: x of shape (batch, n)
    x2d = jax.random.normal(k2d, (8, n), dtype=jnp.float32)
    y2d = my_batch_norm(x2d, gamma, beta)
    jax.block_until_ready(y2d)

    # 3-D branch: x of shape (batch, seq, n)  (PyTorch would transpose(1,2))
    x3d = jax.random.normal(k3d, (2, 8, n), dtype=jnp.float32)
    y3d = my_batch_norm(x3d, gamma, beta)
    jax.block_until_ready(y3d)

    # Multi-tile path: exercises several M-tiles through the 2-phase grid.
    xbig = jax.random.normal(kbig, (4, 64, n), dtype=jnp.float32)
    ybig = my_batch_norm(xbig, gamma, beta, block_rows=8)
    jax.block_until_ready(ybig)

    # Sanity check against pure-JAX reference.
    ref2d = _reference_bn(x2d, gamma, beta)
    ref3d = _reference_bn(x3d, gamma, beta)
    refbig = _reference_bn(xbig, gamma, beta)
    assert jnp.allclose(y2d, ref2d, atol=1e-5, rtol=1e-4)
    assert jnp.allclose(y3d, ref3d, atol=1e-5, rtol=1e-4)
    assert jnp.allclose(ybig, refbig, atol=1e-5, rtol=1e-4)

    print("KERNEL_OK")
</pallas_src>

<mosaic_0001>
module attributes {stable_mosaic.version = 11 : i64} {
  func.func @_bn_kernel(%arg0: i32, %arg1: i32, %arg2: memref<8x128xf32, #tpu.memory_space<vmem>>, %arg3: memref<1x128xf32, #tpu.memory_space<vmem>>, %arg4: memref<1x128xf32, #tpu.memory_space<vmem>>, %arg5: memref<8x128xf32, #tpu.memory_space<vmem>>, %arg6: memref<8x128xf32, #tpu.memory_space<vmem>>, %arg7: memref<8x128xf32, #tpu.memory_space<vmem>>, %arg8: memref<1x128xf32, #tpu.memory_space<vmem>>, %arg9: memref<1x128xf32, #tpu.memory_space<vmem>>) attributes {dimension_semantics = [#tpu.dimension_semantics<arbitrary>, #tpu.dimension_semantics<arbitrary>], iteration_bounds = array<i64: 2, 1>, scalar_prefetch = 0 : i64, scratch_operands = 4 : i64, tpu.core_type = #tpu.core_type<tc>, window_params = [{transform_indices = @transform_0, window_bounds = array<i64: 8, 128>}, {pipeline_mode = #tpu.pipeline_mode<synchronous>, transform_indices = @transform_1, window_bounds = array<i64: 1, 128>}, {pipeline_mode = #tpu.pipeline_mode<synchronous>, transform_indices = @transform_2, window_bounds = array<i64: 1, 128>}, {transform_indices = @transform_3, window_bounds = array<i64: 8, 128>}]} {
    %c0_i32 = arith.constant 0 : i32
    %0 = arith.cmpi eq, %arg0, %c0_i32 : i32
    %1 = arith.extui %0 : i1 to i32
    %c0_i32_0 = arith.constant 0 : i32
    %2 = arith.cmpi ne, %1, %c0_i32_0 : i32
    scf.if %2 {
      %c0_i32_2 = arith.constant 0 : i32
      %6 = arith.cmpi eq, %arg1, %c0_i32_2 : i32
      %7 = arith.extui %6 : i1 to i32
      %c0_i32_3 = arith.constant 0 : i32
      %8 = arith.cmpi ne, %7, %c0_i32_3 : i32
      scf.if %8 {
        %cst_16 = arith.constant 0.000000e+00 : f32
        %23 = vector.broadcast %cst_16 : f32 to vector<8x128xf32>
        %c0_17 = arith.constant 0 : index
        %c0_18 = arith.constant 0 : index
        %24 = vector.load %arg6[%c0_17, %c0_18] : memref<8x128xf32, #tpu.memory_space<vmem>>, vector<8x128xf32>
        tpu.vector_store %arg6[%c0_17, %c0_18], %23 {strides = array<i32>} : memref<8x128xf32, #tpu.memory_space<vmem>>, vector<8x128xf32>,
        %cst_19 = arith.constant 0.000000e+00 : f32
        %25 = vector.broadcast %cst_19 : f32 to vector<8x128xf32>
        %c0_20 = arith.constant 0 : index
        %c0_21 = arith.constant 0 : index
        %26 = vector.load %arg7[%c0_20, %c0_21] : memref<8x128xf32, #tpu.memory_space<vmem>>, vector<8x128xf32>
        tpu.vector_store %arg7[%c0_20, %c0_21], %25 {strides = array<i32>} : memref<8x128xf32, #tpu.memory_space<vmem>>, vector<8x128xf32>,
      } else {
      }
      %c0 = arith.constant 0 : index
      %c0_4 = arith.constant 0 : index
      %9 = vector.load %arg2[%c0, %c0_4] : memref<8x128xf32, #tpu.memory_space<vmem>>, vector<8x128xf32>
      %10 = vector.shape_cast %9 : vector<8x128xf32> to vector<1x8x128xf32>
      %c0_5 = arith.constant 0 : index
      %c0_6 = arith.constant 0 : index
      %11 = vector.load %arg6[%c0_5, %c0_6] : memref<8x128xf32, #tpu.memory_space<vmem>>, vector<8x128xf32>
      %cst = arith.constant dense<0.000000e+00> : vector<8x128xf32>
      %12 = vector.multi_reduction <add>, %10, %cst [0] : vector<1x8x128xf32> to vector<8x128xf32>
      %13 = arith.addf %11, %12 : vector<8x128xf32>
      %c0_7 = arith.constant 0 : index
      %c0_8 = arith.constant 0 : index
      %14 = vector.load %arg6[%c0_7, %c0_8] : memref<8x128xf32, #tpu.memory_space<vmem>>, vector<8x128xf32>
      tpu.vector_store %arg6[%c0_7, %c0_8], %13 {strides = array<i32>} : memref<8x128xf32, #tpu.memory_space<vmem>>, vector<8x128xf32>,
      %c0_9 = arith.constant 0 : index
      %c0_10 = arith.constant 0 : index
      %15 = vector.load %arg7[%c0_9, %c0_10] : memref<8x128xf32, #tpu.memory_space<vmem>>, vector<8x128xf32>
      %16 = arith.mulf %10, %10 : vector<1x8x128xf32>
      %cst_11 = arith.constant dense<0.000000e+00> : vector<8x128xf32>
      %17 = vector.multi_reduction <add>, %16, %cst_11 [0] : vector<1x8x128xf32> to vector<8x128xf32>
      %18 = arith.addf %15, %17 : vector<8x128xf32>
      %c0_12 = arith.constant 0 : index
      %c0_13 = arith.constant 0 : index
      %19 = vector.load %arg7[%c0_12, %c0_13] : memref<8x128xf32, #tpu.memory_space<vmem>>, vector<8x128xf32>
      tpu.vector_store %arg7[%c0_12, %c0_13], %18 {strides = array<i32>} : memref<8x128xf32, #tpu.memory_space<vmem>>, vector<8x128xf32>,
      %c0_i32_14 = arith.constant 0 : i32
      %20 = arith.cmpi eq, %arg1, %c0_i32_14 : i32
      %21 = arith.extui %20 : i1 to i32
      %c0_i32_15 = arith.constant 0 : i32
      %22 = arith.cmpi ne, %21, %c0_i32_15 : i32
      scf.if %22 {
        %c0_16 = arith.constant 0 : index
        %c0_17 = arith.constant 0 : index
        %23 = vector.load %arg6[%c0_16, %c0_17] : memref<8x128xf32, #tpu.memory_space<vmem>>, vector<8x128xf32>
        %c0_18 = arith.constant 0 : index
        %c0_19 = arith.constant 0 : index
        %24 = vector.load %arg7[%c0_18, %c0_19] : memref<8x128xf32, #tpu.memory_space<vmem>>, vector<8x128xf32>
        %c32_i32 = arith.constant 32 : i32
        %25 = tpu.dynamic_rotate %23 by %c32_i32 dim 1 : vector<8x128xf32>, i32 -> vector<8x128xf32>
        %26 = arith.addf %23, %25 : vector<8x128xf32>
        %c32_i32_20 = arith.constant 32 : i32
        %27 = tpu.dynamic_rotate %24 by %c32_i32_20 dim 1 : vector<8x128xf32>, i32 -> vector<8x128xf32>
        %28 = arith.addf %24, %27 : vector<8x128xf32>
        %c64_i32 = arith.constant 64 : i32
        %29 = tpu.dynamic_rotate %26 by %c64_i32 dim 1 : vector<8x128xf32>, i32 -> vector<8x128xf32>
        %30 = arith.addf %26, %29 : vector<8x128xf32>
        %c64_i32_21 = arith.constant 64 : i32
        %31 = tpu.dynamic_rotate %28 by %c64_i32_21 dim 1 : vector<8x128xf32>, i32 -> vector<8x128xf32>
        %32 = arith.addf %28, %31 : vector<8x128xf32>
        %cst_22 = arith.constant dense<0.000000e+00> : vector<128xf32>
        %33 = vector.multi_reduction <add>, %30, %cst_22 [0] : vector<8x128xf32> to vector<128xf32>
        %34 = vector.shape_cast %33 : vector<128xf32> to vector<1x128xf32>
        %cst_23 = arith.constant dense<0.000000e+00> : vector<128xf32>
        %35 = vector.multi_reduction <add>, %32, %cst_23 [0] : vector<8x128xf32> to vector<128xf32>
        %36 = vector.shape_cast %35 : vector<128xf32> to vector<1x128xf32>
        %cst_24 = arith.constant 1.250000e-01 : f32
        %37 = vector.broadcast %cst_24 : f32 to vector<1x128xf32>
        %38 = arith.mulf %34, %37 : vector<1x128xf32>
        %cst_25 = arith.constant 1.250000e-01 : f32
        %39 = vector.broadcast %cst_25 : f32 to vector<1x128xf32>
        %40 = arith.mulf %36, %39 : vector<1x128xf32>
        %41 = arith.mulf %38, %38 : vector<1x128xf32>
        %42 = arith.subf %40, %41 : vector<1x128xf32>
        %cst_26 = arith.constant 9.99999974E-6 : f32
        %43 = vector.broadcast %cst_26 : f32 to vector<1x128xf32>
        %44 = arith.addf %42, %43 : vector<1x128xf32>
        %45 = math.rsqrt %44 : vector<1x128xf32>
        %c0_27 = arith.constant 0 : index
        %c0_28 = arith.constant 0 : index
        %46 = vector.load %arg3[%c0_27, %c0_28] : memref<1x128xf32, #tpu.memory_space<vmem>>, vector<1x128xf32>
        %47 = arith.mulf %46, %45 : vector<1x128xf32>
        %c0_29 = arith.constant 0 : index
        %c0_30 = arith.constant 0 : index
        %48 = vector.load %arg8[%c0_29, %c0_30] : memref<1x128xf32, #tpu.memory_space<vmem>>, vector<1x128xf32>
        tpu.vector_store %arg8[%c0_29, %c0_30], %47 {strides = array<i32>} : memref<1x128xf32, #tpu.memory_space<vmem>>, vector<1x128xf32>,
        %c0_31 = arith.constant 0 : index
        %c0_32 = arith.constant 0 : index
        %49 = vector.load %arg4[%c0_31, %c0_32] : memref<1x128xf32, #tpu.memory_space<vmem>>, vector<1x128xf32>
        %50 = arith.mulf %38, %47 : vector<1x128xf32>
        %51 = arith.subf %49, %50 : vector<1x128xf32>
        %c0_33 = arith.constant 0 : index
        %c0_34 = arith.constant 0 : index
        %52 = vector.load %arg9[%c0_33, %c0_34] : memref<1x128xf32, #tpu.memory_space<vmem>>, vector<1x128xf32>
        tpu.vector_store %arg9[%c0_33, %c0_34], %51 {strides = array<i32>} : memref<1x128xf32, #tpu.memory_space<vmem>>, vector<1x128xf32>,
      } else {
      }
    } else {
    }
    %c1_i32 = arith.constant 1 : i32
    %3 = arith.cmpi eq, %arg0, %c1_i32 : i32
    %4 = arith.extui %3 : i1 to i32
    %c0_i32_1 = arith.constant 0 : i32
    %5 = arith.cmpi ne, %4, %c0_i32_1 : i32
    scf.if %5 {
      %c0 = arith.constant 0 : index
      %c0_2 = arith.constant 0 : index
      %6 = vector.load %arg2[%c0, %c0_2] : memref<8x128xf32, #tpu.memory_space<vmem>>, vector<8x128xf32>
      %c0_3 = arith.constant 0 : index
      %c0_4 = arith.constant 0 : index
      %7 = vector.load %arg8[%c0_3, %c0_4] : memref<1x128xf32, #tpu.memory_space<vmem>>, vector<1x128xf32>
      %8 = vector.broadcast %7 : vector<1x128xf32> to vector<8x128xf32>
      %9 = arith.mulf %6, %8 : vector<8x128xf32>
      %c0_5 = arith.constant 0 : index
      %c0_6 = arith.constant 0 : index
      %10 = vector.load %arg9[%c0_5, %c0_6] : memref<1x128xf32, #tpu.memory_space<vmem>>, vector<1x128xf32>
      %11 = vector.broadcast %10 : vector<1x128xf32> to vector<8x128xf32>
      %12 = arith.addf %9, %11 : vector<8x128xf32>
      %c0_7 = arith.constant 0 : index
      %c0_8 = arith.constant 0 : index
      %13 = vector.load %arg5[%c0_7, %c0_8] : memref<8x128xf32, #tpu.memory_space<vmem>>, vector<8x128xf32>
      tpu.vector_store %arg5[%c0_7, %c0_8], %12 {strides = array<i32>} : memref<8x128xf32, #tpu.memory_space<vmem>>, vector<8x128xf32>,
    } else {
    }
    return
  }
  func.func @transform_0(%arg0: i32, %arg1: i32) -> (i32, i32) {
    %c0_i32 = arith.constant 0 : i32
    %c0_i32_0 = arith.constant 0 : i32
    return %arg1, %c0_i32 : i32, i32
  }
  func.func @transform_1(%arg0: i32, %arg1: i32) -> (i32, i32) {
    %c0_i32 = arith.constant 0 : i32
    %c0_i32_0 = arith.constant 0 : i32
    %c0_i32_1 = arith.constant 0 : i32
    return %c0_i32, %c0_i32_0 : i32, i32
  }
  func.func @transform_2(%arg0: i32, %arg1: i32) -> (i32, i32) {
    %c0_i32 = arith.constant 0 : i32
    %c0_i32_0 = arith.constant 0 : i32
    %c0_i32_1 = arith.constant 0 : i32
    return %c0_i32, %c0_i32_0 : i32, i32
  }
  func.func @transform_3(%arg0: i32, %arg1: i32) -> (i32, i32) {
    %0 = arith.muli %arg0, %arg1 : i32
    %c0_i32 = arith.constant 0 : i32
    %c0_i32_0 = arith.constant 0 : i32
    return %0, %c0_i32 : i32, i32
  }
}

</mosaic_0001>

<bundles_post_ra>
// kernel: tpu_custom_call.1
= control target key start
LH: loop header
LB: loop body
LE: loop exit
PB: predicated region body
PF: predicated region fallthrough
CT: control target
= control target key end

     0   :  { %8 = vsyncpa [#allocation7], 0  ;;  %s684_s0 = inlined_call_operand.hbm [shape: f32[8,128], index: 0, kind: input, shape index: {}]   ;;  %s685_s1 = inlined_call_operand.hbm [shape: f32[1,128], index: 1, kind: input, shape index: {}]   ;;  %s686_s2 = inlined_call_operand.vmem [shape: f32[1,128], index: 2, kind: input, shape index: {}]   ;;  %s687_s3 = inlined_call_operand.hbm [shape: f32[8,128], index: 3, kind: output, shape index: {}]  }
   0x1   :  { %9 = vsyncpa [#allocation10], 0 }
   0x2   :  { %10 = vsyncpa [#allocation8], 0 }
   0x3   :  { %12 = vsyncpa [#allocation8 + $0x1], 0  ;;  %s610_s12 = smov 0   ;;  %s612_s13 = smov 0  }
   0x4   :  { %s614_s14 = smov 0  }
   0x5 LB: > { %s384_s15 = sadd.s32 4294967295, %s583_s14   ;;  %s385_s16 = sadd.s32 4294967294, %s583_s14   ;;  %s583_s14 = sphi %s614_s14, %s18_s14   ;;  %s579_s13 = sphi %s612_s13, %s691_s13   ;;  %s575_s12 = sphi %s610_s12, %s690_s12  }
   0x6   : > { %s30_s17 = sadd.s32 1, %s579_s13  ;;  %p386_p0 = scmp.ge.s32.totalorder %s583_s14, 1 }
   0x7   : > { %p32_p1 = scmp.ge.s32.totalorder %s30_s17, 2  ;;  %p131_p2 = scmp.lt.s32.totalorder %s583_s14, 3 }
   0x8   : > { %p632_p3 = scmp.eq.s32.totalorder %s384_s15, 0  ;;  %s145_s22 = sshll.u32 %s684_s0, 4  ;;  %s146_s22 = int_to_ptr.hbm [resolvable:$true] %s145_s22 }
   0x9   : > { %s693_s17 = smov (%p32_p1, %s30_s17), 0  ;;  %p638_p4 = pnand %p386_p0, %p131_p2 }
   0xa   : > { %s585_s23 = smov [#allocation6]   ;;  %s157_s27 = sshll.u32 %s685_s1, 4  ;;  %s158_s27 = int_to_ptr.hbm [resolvable:$true] %s157_s27 }
   0xb   : > { %p410_p5 = pneg %p638_p4  ;;  %s147_s24 = sshll.u32 %s585_s23, 4  ;;  %s148_s24 = int_to_ptr.vmem [resolvable:$true] %s147_s24 }
   0xc   : > { %s586_s28 = smov [#allocation9]   ;;  %175 = sbr.rel (%p638_p4) target bundleno = 330 (0x14a), region = 32 }
   0xd   : > { %p411_p6 = pnand %p632_p3, %p410_p5  ;;  %s159_s29 = sshll.u32 %s586_s28, 4  ;;  %s160_s29 = int_to_ptr.vmem [resolvable:$true] %s159_s29 }
   0xf   : > { %413 = dma.hbm_to_vmem [thread:$0]  (!%p411_p6), %s146_s22, 128, %s148_s24, [#allocation7]  }
  0x10   : > { %416 = dma.hbm_to_vmem [thread:$0]  (!%p411_p6), %s158_s27, 16, %s160_s29, [#allocation10]  }
  0x11   : > { %562 = dma.done.wait (%p632_p3), [#allocation7], 128  }
  0x12   : > { %564 = vsyncadd (%p632_p3), [#allocation7], 4294967168 }
  0x13   : > { %566 = dma.done.wait (%p632_p3), [#allocation10], 16  }
  0x14   : > { %568 = vsyncadd (%p632_p3), [#allocation10], 4294967280  ;;  %p392_p7 = scmp.ne.s32.totalorder %s575_s12, 0 }
  0x15   : > { %s587_s30 = smov (!%p392_p7), 32   ;;  %s588_s4 = smov (!%p392_p7), 64  }
  0x16   : > { %204 = sbr.rel (%p392_p7) target bundleno = 313 (0x139), region = 44 }
  0x1b   : > { %v211_v0 = vld [vmem:[#allocation6] sm:$0xff]  ;;  %v265_v32 = vld [vmem:[#allocation9] sm:$0x1]  ;;  %v268_v36 = vld [vmem:[%s686_s2] sm:$0x1] }
  0x1c   : > { %226 = vrot.lane.b32.xlu0 %v211_v0, %s587_s30  ;;  %v217_v1 = vmul.f32 %v211_v0, %v211_v0 }
  0x24   : > { %229 = vrot.lane.b32.xlu0 %v217_v1, %s587_s30 }
  0x8e   : > { %v227_v2 = vpop.permute.xlu0 %226 }
  0x8f   : > { %v228_v3 = vadd.f32 %v227_v2, %v211_v0 }
  0x91   : > { %232 = vrot.lane.b32.xlu1 %v228_v3, %s588_s4 }
  0x96   : > { %v230_v4 = vpop.permute.xlu0 %229 }
  0x97   : > { %v231_v5 = vadd.f32 %v230_v4, %v217_v1 }
  0x99   : > { %235 = vrot.lane.b32.xlu1 %v231_v5, %s588_s4 }
 0x103   : > { %v233_v6 = vpop.permute.xlu1 %232 }
 0x104   : > { %v234_v7 = vadd.f32 %v233_v6, %v228_v3 }
 0x106   : > { %v238_v8 = vrot.slane %v234_v7, 4 }
 0x108   : > { %v239_v9 = vadd.f32 %v238_v8, %v234_v7 }
 0x10a   : > { %v240_v10 = vrot.slane %v239_v9, 2 }
 0x10b   : > { %v236_v11 = vpop.permute.xlu1 %235 }
 0x10c   : > { %v241_v12 = vadd.f32 %v240_v10, %v239_v9  ;;  %v237_v13 = vadd.f32 %v236_v11, %v231_v5 }
 0x10e   : > { %v242_v14 = vrot.slane %v241_v12, 1  ;;  %v244_v15 = vrot.slane %v237_v13, 4 }
 0x110   : > { %v245_v16 = vadd.f32 %v244_v15, %v237_v13  ;;  %v243_v17 = vadd.f32 %v242_v14, %v241_v12 }
 0x112   : > { %v246_v18 = vrot.slane %v245_v16, 2  ;;  %v250_v20 = vmul.f32 0.125, %v243_v17 }
 0x114   : > { %v247_v19 = vadd.f32 %v246_v18, %v245_v16  ;;  %v252_v23 = vmul.f32 %v250_v20, %v250_v20 }
 0x116   : > { %v248_v21 = vrot.slane %v247_v19, 1 }
 0x118   : > { %v249_v22 = vadd.f32 %v248_v21, %v247_v19 }
 0x11a   : > { %v251_v24 = vmul.f32 0.125, %v249_v22 }
 0x11c   : > { %v253_v25 = vsub.f32 %v251_v24, %v252_v23 }
 0x11e   : > { %v254_v26 = vadd.f32 1e-05, %v253_v25 }
 0x120   : > { %457 = vrsqrt.f32 %v254_v26  ;;  %vm261_vm1 = vweird.f32 %v254_v26 }
 0x126   : > { %v458_v27 = vpop.eup %457 }
 0x127   : > { %v256_v28 = vmul.f32 %v458_v27, %v254_v26  ;;  %vm262_vm0 = vweird.f32 %v458_v27 }
 0x128   : > { %vm263_vm2 = vmor %vm261_vm1, %vm262_vm0 }
 0x129   : > { %v257_v29 = vmul.f32 %v458_v27, %v256_v28 }
 0x12b   : > { %v258_v30 = vmul.f32 0.5, %v257_v29 }
 0x12d   : > { %v259_v31 = vsub.f32 1.5, %v258_v30 }
 0x12f   : > { %v260_v33 = vmul.f32 %v458_v27, %v259_v31 }
 0x131   : > { %v264_v34 = vsel %vm263_vm2, %v458_v27, %v260_v33 }
 0x132   : > { %v266_v35 = vmul.f32 %v265_v32, %v264_v34 }
 0x134   : > { %267 = vst [vmem:[#allocation4] sm:$0x1] %v266_v35  ;;  %v269_v37 = vmul.f32 %v266_v35, %v250_v20 }
 0x136   : > { %v270_v38 = vsub.f32 %v268_v36, %v269_v37 }
 0x138   : > { %271 = vst [vmem:[#allocation5] sm:$0x1] %v270_v38 }
 0x139 PF: > { %p393_p8 = scmp.ne.s32.totalorder %s575_s12, 1 }
 0x13b   : > { %275 = sbr.rel (%p393_p8) target bundleno = 326 (0x146), region = 56 }
 0x140   : > { %v276_v39 = vld [vmem:[#allocation6] sm:$0xff]  ;;  %v459_v40 = vld [vmem:[#allocation4] ss:$0 sm:$0xff]  ;;  %v460_v41 = vld [vmem:[#allocation5] ss:$0 sm:$0xff] }
 0x141   : > { %v281_v42 = vmul.f32 %v459_v40, %v276_v39 }
 0x143   : > { %v286_v43 = vadd.f32 %v460_v41, %v281_v42 }
 0x145   : > { %287 = vst [vmem:[#allocation11] sm:$0xff] %v286_v43 }
 0x146 PF: > { %p425_p9 = scmp.eq.s32.totalorder %s384_s15, 1  ;;  %s304_s9 = sshll.u32 %s687_s3, 4  ;;  %s305_s9 = int_to_ptr.hbm [resolvable:$true] %s304_s9 }
 0x147   : > { %s589_s10 = smov [#allocation11]  }
 0x148   : > { %s302_s11 = sshll.u32 %s589_s10, 4  ;;  %s303_s11 = int_to_ptr.vmem [resolvable:$true] %s302_s11 }
 0x149   : > { %407 = dma.vmem_to_hbm [thread:$0]  (%p425_p9), %s303_s11, 128, %s305_s9, [#allocation8]  }
 0x14a PF: > { %p426_p10 = scmp.ge.s32.totalorder %s583_s14, 2  ;;  %p427_p11 = scmp.eq.s32.totalorder %s385_s16, 1 }
 0x14c   : > { %p418_p12 = pnand %p427_p11, %p426_p10 }
 0x14e   : > { %p419_p13 = pneg %p418_p12 }
 0x150   : > { %570 = dma.done.wait (%p419_p13), [#allocation8], 128  }
 0x151   : > { %572 = vsyncadd (%p419_p13), [#allocation8], 4294967168  ;;  %s18_s14 = sadd.s32 1, %s583_s14   ;;  %s690_s12 = smov %s579_s13 }
 0x152   : > { %p15_p0 = scmp.ge.s32.totalorder %s18_s14, 4   ;;  %s691_s13 = smov %s693_s17 }
 0x154   :  { %17 = sbr.rel (!%p15_p0) target bundleno = 5 (0x5), region = 90 }
 0x159   :  { %323 = vsyncpa [#allocation7], 1 }
 0x15a   :  { %325 = vsyncpa [#allocation7 + $0x1], 1 }
 0x15b   :  { %326 = vsyncpa [#allocation10], 1 }
 0x15c   :  { %327 = vsyncpa [#allocation8], 1 }
 0x15d   :  { %329 = vsyncpa [#allocation8 + $0x1], 1 }

</bundles_post_ra>
